<compile_context>
chip_gen: v6e
topology: v6e:2x2x1
jax: 0.10.0
libtpu: 0.0.40
codegen_flags: <defaults>
</compile_context>

<pallas_src>
import functools

import jax
import jax.numpy as jnp
from jax.experimental import pallas as pl
from jax.experimental.pallas import tpu as pltpu

_LANE = 128


def _round_down(x, m):
    return (x // m) * m


def _round_up(x, m):
    return ((x + m - 1) // m) * m


def _vmem_capacity_bytes(default=64 << 20):
    """Physical VMEM per TensorCore; conservative (v7x-sized) default if unknown."""
    try:
        info = pltpu.get_tpu_info()
        cap = getattr(info, "vmem_capacity_bytes", None)
        if cap:
            return int(cap)
    except Exception:
        pass
    return default


def _choose_tiles(R, L, itemsize, target_bytes, vmem_budget_bytes):
    """Pick (TR, TL) so each grid step moves ~target_bytes of input from HBM
    while the lane-padded VMEM buffers stay within vmem_budget_bytes."""
    sub = {1: 32, 2: 16}.get(itemsize, 8)          # sublane multiple for dtype
    target_elems = max(target_bytes // itemsize, sub * _LANE)

    if R * L <= target_elems:
        # Whole problem fits in a single grid step.
        TR, TL = R, L
    else:
        rows_full_l = target_elems // L            # rows affordable with full L
        if rows_full_l >= sub:
            # Single pass over L; as many rows per step as the byte budget allows.
            TR, TL = _round_down(min(rows_full_l, R), sub), L
        else:
            # L too long even for `sub` rows per step: split the reduction axis
            # into lane-aligned chunks (bounded to keep the in-kernel unroll sane).
            TR = R if R <= _LANE else _LANE
            if L <= _LANE:
                TL = L
            else:
                tl_budget = max(target_elems // TR, _LANE)
                TL = max(_LANE, min(_round_down(tl_budget, _LANE),
                                    _round_down(L, _LANE), 128 * _LANE))

    # VMEM clamp: the minor dim of every buffer is padded to 128 lanes in VMEM,
    # which matters when TL (or the output/accumulator width) is small. Count
    # double-buffered input + output plus one f32 accumulator row.
    bytes_per_row = 2 * itemsize * (_round_up(TL, _LANE) + _LANE) + 4 * _LANE
    max_tr = max(vmem_budget_bytes // bytes_per_row, sub)
    if TR > max_tr:
        TR = _round_down(max_tr, sub)

    # v7x megacore: make sure the "parallel" row axis has >= 2 blocks so both
    # TensorCores get work (harmless extra grid step on single-core v5e/v6e).
    if R >= 2 * sub and pl.cdiv(R, TR) < 2:
        half = _round_up((R + 1) // 2, sub)
        if half < R:
            TR = half
    return TR, TL


def _gap1d_kernel(x_ref, o_ref, acc_ref, *, true_l, tl, inv_l, n_l_steps,
                  lane_chunks):
    j = pl.program_id(1)                  # reduction (L) step; last grid axis

    @pl.when(j == 0)
    def _init():
        acc_ref[...] = jnp.zeros_like(acc_ref)

    def _accumulate(v):
        if lane_chunks > 0:
            # Lane-parallel partial sums: per-step work is VPU-only adds into a
            # (TR, 128) accumulator; the cross-lane reduce + relayout happen
            # once per row tile (in _finalize), not on every L step.
            acc = acc_ref[...]
            for c in range(lane_chunks):
                acc = acc + v[:, c * _LANE:(c + 1) * _LANE].astype(jnp.float32)
            acc_ref[...] = acc
        else:
            # Single L step per row tile: one cross-lane reduce in total.
            acc_ref[...] += jnp.sum(v, axis=-1, keepdims=True, dtype=jnp.float32)

    if true_l % tl != 0:
        # A padded tail exists only in the last L tile: mask only that step.
        @pl.when(j < n_l_steps - 1)
        def _full_tiles():
            _accumulate(x_ref[...])

        @pl.when(j == n_l_steps - 1)
        def _tail_tile():
            v = x_ref[...]
            col = jax.lax.broadcasted_iota(jnp.int32, v.shape, 1) + j * tl
            _accumulate(jnp.where(col < true_l, v, jnp.zeros_like(v)))
    else:
        _accumulate(x_ref[...])

    @pl.when(j == n_l_steps - 1)
    def _finalize():
        row_sum = jnp.sum(acc_ref[...], axis=-1, keepdims=True)   # (TR, 1)
        o_ref[...] = (row_sum * inv_l).astype(o_ref.dtype)


def global_avg_pool1d(x, *, tile_target_bytes=8 << 20):
    """x: (N, C, L) -> (N, C); mean over the last axis (== torch.mean(x, -1))."""
    N, C, L = x.shape
    R = N * C
    xf = x.reshape(R, L)                     # collapse leading dims (free)
    itemsize = jnp.dtype(x.dtype).itemsize
    sub = {1: 32, 2: 16}.get(itemsize, 8)

    vmem_cap = (_vmem_capacity_bytes() * 3) // 4          # stay below physical
    vmem_budget = max(vmem_cap - (4 << 20), 8 << 20)      # buffers budget
    target_bytes = min(int(tile_target_bytes), vmem_cap // 3)

    TR, TL = _choose_tiles(R, L, itemsize, target_bytes, vmem_budget)
    n_row_blocks = pl.cdiv(R, TR)
    n_l_steps = pl.cdiv(L, TL)

    # Lane-parallel accumulator only pays off when the L axis is split.
    if n_l_steps > 1 and TL % _LANE == 0:
        lane_chunks, acc_cols = TL // _LANE, _LANE
    else:
        lane_chunks, acc_cols = 0, 1

    kernel = functools.partial(
        _gap1d_kernel, true_l=L, tl=TL, inv_l=1.0 / L,
        n_l_steps=n_l_steps, lane_chunks=lane_chunks)

    # VMEM accounting on *padded* footprints (minor dims pad to 128 lanes).
    pad_tr = _round_up(TR, sub)
    in_buf = pad_tr * _round_up(TL, _LANE) * itemsize
    out_buf = pad_tr * _LANE * itemsize
    acc_buf = pad_tr * _LANE * 4
    vmem_need = 2 * (in_buf + out_buf) + acc_buf + (2 << 20)
    vmem_limit = int(min(max(vmem_need, 16 << 20), vmem_cap))

    cost = pl.CostEstimate(
        flops=R * L,
        transcendentals=0,
        bytes_accessed=R * L * itemsize + R * itemsize)

    out = pl.pallas_call(
        kernel,
        out_shape=jax.ShapeDtypeStruct((R, 1), x.dtype),
        grid=(n_row_blocks, n_l_steps),                   # reduction axis last
        in_specs=[pl.BlockSpec((TR, TL), lambda i, j: (i, j))],
        # Same output block across the L axis => resident output, one writeback
        # per row tile (output traffic is ~1/L of input traffic).
        out_specs=pl.BlockSpec((TR, 1), lambda i, j: (i, 0)),
        scratch_shapes=[pltpu.VMEM((TR, acc_cols), jnp.float32)],
        compiler_params=pltpu.CompilerParams(
            dimension_semantics=("parallel", "arbitrary"),
            vmem_limit_bytes=vmem_limit),
        cost_estimate=cost,
    )(xf)

    return out.reshape(N, C)


if __name__ == "__main__":
    # 1) Basic small case matching the module's (N, C, L) input.
    N, C, L = 2, 4, 16
    x = jax.random.normal(jax.random.PRNGKey(0), (N, C, L), dtype=jnp.float32)
    y = jax.block_until_ready(global_avg_pool1d(x))
    y_ref = jnp.mean(x, axis=-1)
    assert y.shape == (N, C), y.shape
    assert jnp.allclose(y, y_ref, atol=1e-5, rtol=1e-5)

    # 2) Multi-step L reduction with a masked tail tile (tiny byte budget to
    #    force the split even at small shapes).
    x2 = jax.random.normal(jax.random.PRNGKey(1), (3, 5, 300), dtype=jnp.float32)
    y2 = jax.block_until_ready(global_avg_pool1d(x2, tile_target_bytes=4096))
    assert jnp.allclose(y2, jnp.mean(x2, axis=-1), atol=1e-5, rtol=1e-5)

    # 3) Multiple lane chunks per step (lane-parallel accumulator path) + tail mask.
    x3 = jax.random.normal(jax.random.PRNGKey(2), (2, 4, 1000), dtype=jnp.float32)
    y3 = jax.block_until_ready(global_avg_pool1d(x3, tile_target_bytes=8192))
    assert jnp.allclose(y3, jnp.mean(x3, axis=-1), atol=1e-5, rtol=1e-5)

    # 4) Row-axis split so the "parallel" axis has >= 2 blocks (megacore path).
    x4 = jax.random.normal(jax.random.PRNGKey(3), (4, 8, 64), dtype=jnp.float32)
    y4 = jax.block_until_ready(global_avg_pool1d(x4))
    assert jnp.allclose(y4, jnp.mean(x4, axis=-1), atol=1e-5, rtol=1e-5)

    # 5) bf16 input (f32 accumulation in-kernel).
    x5 = jax.random.normal(jax.random.PRNGKey(4), (2, 4, 32), dtype=jnp.bfloat16)
    y5 = jax.block_until_ready(global_avg_pool1d(x5))
    y5_ref = jnp.mean(x5.astype(jnp.float32), axis=-1).astype(jnp.bfloat16)
    assert jnp.allclose(y5.astype(jnp.float32), y5_ref.astype(jnp.float32),
                        atol=2e-2, rtol=2e-2)

    print("KERNEL_OK")
</pallas_src>

<mosaic_0001>
module attributes {stable_mosaic.version = 11 : i64} {
  func.func @_gap1d_kernel(%arg0: i32, %arg1: i32, %arg2: memref<8x16xf32, #tpu.memory_space<vmem>>, %arg3: memref<8x1xf32, #tpu.memory_space<vmem>>, %arg4: memref<8x1xf32, #tpu.memory_space<vmem>>) attributes {dimension_semantics = [#tpu.dimension_semantics<parallel>, #tpu.dimension_semantics<arbitrary>], iteration_bounds = array<i64: 1, 1>, scalar_prefetch = 0 : i64, scratch_operands = 1 : i64, tpu.core_type = #tpu.core_type<tc>, window_params = [{transform_indices = @transform_0, window_bounds = array<i64: 8, 16>}, {transform_indices = @transform_1, window_bounds = array<i64: 8, 1>}]} {
    %c0_i32 = arith.constant 0 : i32
    %0 = arith.cmpi eq, %arg1, %c0_i32 : i32
    %1 = arith.extui %0 : i1 to i32
    %c0_i32_0 = arith.constant 0 : i32
    %2 = arith.cmpi ne, %1, %c0_i32_0 : i32
    scf.if %2 {
      %cst_8 = arith.constant 0.000000e+00 : f32
      %12 = vector.broadcast %cst_8 : f32 to vector<8x1xf32>
      %c0_9 = arith.constant 0 : index
      %c0_10 = arith.constant 0 : index
      %13 = vector.load %arg4[%c0_9, %c0_10] : memref<8x1xf32, #tpu.memory_space<vmem>>, vector<8x1xf32>
      tpu.vector_store %arg4[%c0_9, %c0_10], %12 {strides = array<i32>} : memref<8x1xf32, #tpu.memory_space<vmem>>, vector<8x1xf32>,
    } else {
    }
    %c0 = arith.constant 0 : index
    %c0_1 = arith.constant 0 : index
    %3 = vector.load %arg2[%c0, %c0_1] : memref<8x16xf32, #tpu.memory_space<vmem>>, vector<8x16xf32>
    %c0_2 = arith.constant 0 : index
    %c0_3 = arith.constant 0 : index
    %4 = vector.load %arg4[%c0_2, %c0_3] : memref<8x1xf32, #tpu.memory_space<vmem>>, vector<8x1xf32>
    %cst = arith.constant dense<0.000000e+00> : vector<8xf32>
    %5 = vector.multi_reduction <add>, %3, %cst [1] : vector<8x16xf32> to vector<8xf32>
    %6 = vector.shape_cast %5 : vector<8xf32> to vector<8x1xf32>
    %7 = arith.addf %4, %6 : vector<8x1xf32>
    %c0_4 = arith.constant 0 : index
    %c0_5 = arith.constant 0 : index
    %8 = vector.load %arg4[%c0_4, %c0_5] : memref<8x1xf32, #tpu.memory_space<vmem>>, vector<8x1xf32>
    tpu.vector_store %arg4[%c0_4, %c0_5], %7 {strides = array<i32>} : memref<8x1xf32, #tpu.memory_space<vmem>>, vector<8x1xf32>,
    %c0_i32_6 = arith.constant 0 : i32
    %9 = arith.cmpi eq, %arg1, %c0_i32_6 : i32
    %10 = arith.extui %9 : i1 to i32
    %c0_i32_7 = arith.constant 0 : i32
    %11 = arith.cmpi ne, %10, %c0_i32_7 : i32
    scf.if %11 {
      %c0_8 = arith.constant 0 : index
      %c0_9 = arith.constant 0 : index
      %12 = vector.load %arg4[%c0_8, %c0_9] : memref<8x1xf32, #tpu.memory_space<vmem>>, vector<8x1xf32>
      %cst_10 = arith.constant dense<0.000000e+00> : vector<8xf32>
      %13 = vector.multi_reduction <add>, %12, %cst_10 [1] : vector<8x1xf32> to vector<8xf32>
      %14 = vector.shape_cast %13 : vector<8xf32> to vector<8x1xf32>
      %cst_11 = arith.constant 6.250000e-02 : f32
      %15 = vector.broadcast %cst_11 : f32 to vector<8x1xf32>
      %16 = arith.mulf %14, %15 : vector<8x1xf32>
      %c0_12 = arith.constant 0 : index
      %c0_13 = arith.constant 0 : index
      %17 = vector.load %arg3[%c0_12, %c0_13] : memref<8x1xf32, #tpu.memory_space<vmem>>, vector<8x1xf32>
      tpu.vector_store %arg3[%c0_12, %c0_13], %16 {strides = array<i32>} : memref<8x1xf32, #tpu.memory_space<vmem>>, vector<8x1xf32>,
    } else {
    }
    return
  }
  func.func @transform_0(%arg0: i32, %arg1: i32) -> (i32, i32) {
    %c0_i32 = arith.constant 0 : i32
    return %arg0, %arg1 : i32, i32
  }
  func.func @transform_1(%arg0: i32, %arg1: i32) -> (i32, i32) {
    %c0_i32 = arith.constant 0 : i32
    %c0_i32_0 = arith.constant 0 : i32
    return %arg0, %c0_i32 : i32, i32
  }
}

</mosaic_0001>

<bundles_post_ra>
// kernel: tpu_custom_call.1
= control target key start
LH: loop header
LB: loop body
LE: loop exit
PB: predicated region body
PF: predicated region fallthrough
CT: control target
= control target key end

     0   :  { %6 = vsyncpa [#allocation4], 0  ;;  %s71_s6 = smov [#allocation3]   ;;  %s89_s0 = inlined_call_operand.hbm [shape: f32[8,16], index: 0, kind: input, shape index: {}]   ;;  %s90_s1 = inlined_call_operand.vmem [shape: f32[8,1], index: 1, kind: output, shape index: {}]  }
   0x1   :  { %s13_s7 = sshll.u32 %s71_s6, 4  ;;  %s14_s7 = int_to_ptr.vmem [resolvable:$true] %s13_s7 }
   0x2   :  { %s57_s8 = scalar_lea.vmem %s14_s7, 128  ;;  %p62_p1 = scmp.lt.s32.totalorder %s14_s7, %s14_s7 }
   0x3   :  { %p58_p0 = scmp.ne.s32.totalorder %s14_s7, %s57_s8  ;;  %p63_p2 = scmp.lt.s32.totalorder %s57_s8, %s57_s8 }
   0x5   :  { %p64_p3 = por %p63_p2, %p62_p1 }
   0x7   :  { %p65_p4 = pnand %p64_p3, %p58_p0 }
   0x9   :  { %68 = shalt.err (!%p65_p4)
}
   0xa   :  { %16 = dma.hbm_to_vmem [thread:$0]  %s89_s0, 128, %s14_s7, [#allocation4]  }
   0xb   :  { %69 = dma.done.wait [#allocation4], 128  }
   0xc   :  { %70 = vsyncadd [#allocation4], 4294967168  ;;  %vm24_vm0 = vcmask 7168   ;;  %v72_v0 = vmov 0.0   ;;  %vm28_vm1 = vcmask 130048   ;;  %v26_v1 = vld [vmem:[#allocation3] sm:$0xff] }
   0xd   :  { %25 = vst.msk [vmem:[#allocation2] sm:$0xff] %vm24_vm0, %v72_v0  ;;  %v29_v2 = vsel %vm28_vm1, %v26_v1, 0.0 }
   0xe   :  { %30 = vadd.xlane.f32.xlu0 %v29_v2 }
  0x14   :  { %v27_v3 = vld [vmem:[#allocation2] sm:$0xff] }
  0x97   :  { %v31_v4 = vpop.xlane.xlu0 %30 }
  0x98   :  { %v32_v5 = vadd.f32 %v31_v4, %v27_v3 }
  0x9a   :  { %34 = vst.msk [vmem:[#allocation2] sm:$0xff] %vm24_vm0, %v32_v5 }
  0xa1   :  { %v38_v6 = vld [vmem:[#allocation2] sm:$0xff] }
  0xa2   :  { %v40_v7 = vmul.f32 0.0625, %v38_v6 }
  0xa4   :  { %41 = vst.msk [vmem:[%s90_s1] sm:$0xff] %vm24_vm0, %v40_v7 }
  0xa5   :  { %46 = vsyncpa [#allocation4], 1 }

</bundles_post_ra>
